<compile_context>
chip_gen: v5e
topology: v5e:2x2
jax: 0.10.0
libtpu: 0.0.40
codegen_flags: <defaults>
</compile_context>

<pallas_src>
import functools

import jax
import jax.numpy as jnp
from jax.experimental import pallas as pl
from jax.experimental.pallas import tpu as pltpu


def _round_up(x, m):
    return ((x + m - 1) // m) * m


# ---------------------------------------------------------------------------
# Kernel A: SE global average pool (AdaptiveAvgPool2d(1)) over [N*C, H*W]
# ---------------------------------------------------------------------------
def _se_pool_kernel(x_ref, o_ref, acc_ref, *, inv_hw):
    s = pl.program_id(1)

    @pl.when(s == 0)
    def _():
        acc_ref[...] = jnp.zeros_like(acc_ref)

    xt = x_ref[...].astype(jnp.float32)           # native-dtype tile, upcast in VMEM
    tr, thw = xt.shape
    # Lane-dense VPU accumulation: fold groups of 128 lanes onto the (tr, 128)
    # accumulator (no degenerate (thw, 1) MXU contraction, no 1-lane scratch).
    acc_ref[...] += jnp.sum(xt.reshape(tr, thw // 128, 128), axis=1)

    @pl.when(s == pl.num_programs(1) - 1)
    def _():
        # One cross-lane (XLU) reduction, only in the finalize step.
        o_ref[...] = jnp.sum(acc_ref[...], axis=1, keepdims=True) * inv_hw


def se_global_avg_pool(x, *, row_tile=256, hw_tile=4096):
    """x: [N, C, H, W] (NCHW-contiguous, any float dtype). Returns [N, C] f32 means."""
    N, C, H, W = x.shape
    R, HW = N * C, H * W
    x2 = x.reshape(R, HW)                         # dense sublanes, native dtype

    tr = min(_round_up(row_tile, 8), _round_up(R, 8))
    thw = min(_round_up(hw_tile, 128), _round_up(HW, 128))
    r_pad = _round_up(R, tr)
    hw_pad = _round_up(HW, thw)
    if (r_pad, hw_pad) != (R, HW):
        x2 = jnp.pad(x2, ((0, r_pad - R), (0, hw_pad - HW)))  # zero pad: sum unaffected

    grid = (r_pad // tr, hw_pad // thw)           # reduction (spatial) axis last
    pooled = pl.pallas_call(
        functools.partial(_se_pool_kernel, inv_hw=1.0 / float(HW)),
        out_shape=jax.ShapeDtypeStruct((r_pad, 1), jnp.float32),
        grid=grid,
        in_specs=[pl.BlockSpec((tr, thw), lambda r, s: (r, s))],
        out_specs=pl.BlockSpec((tr, 1), lambda r, s: (r, 0)),
        scratch_shapes=[pltpu.VMEM((tr, 128), jnp.float32)],
        compiler_params=pltpu.CompilerParams(
            dimension_semantics=("parallel", "arbitrary"),
            vmem_limit_bytes=32 * 1024 * 1024),   # <= 4 MiB per input buffer: v7x-safe
    )(x2)
    return pooled[:R, 0].reshape(N, C)


# ---------------------------------------------------------------------------
# Kernel B: SE gate MLP (1x1 convs + LeakyReLU + sigmoid) fused with the scaler
#           ConvTranspose2d on the 1x1 gate (== one matmul), tiled over
#           lane-dense 128-column output blocks in NCHW-flat column order.
# ---------------------------------------------------------------------------
def _se_gate_scaler_kernel(p_ref, w1_ref, b1_ref, w2_ref, b2_ref,
                           ws_ref, bs_ref, o_ref):
    p = p_ref[...]
    h = jnp.dot(p, w1_ref[...], preferred_element_type=jnp.float32) + b1_ref[...]
    h = jnp.where(h > 0, h, 0.01 * h)                       # LeakyReLU(0.01)
    z = jnp.dot(h, w2_ref[...], preferred_element_type=jnp.float32) + b2_ref[...]
    g = jax.nn.sigmoid(z)                                   # EUP path
    # ConvTranspose2d on a 1x1 map: out[n, co, i, j] = sum_ci g[n,ci]*W[ci,co,i,j]+b
    o_ref[...] = jnp.dot(g, ws_ref[...], preferred_element_type=jnp.float32) + bs_ref[...]


def se_gate_and_scaler(pooled, w_se1, b_se1, w_se2, b_se2, w_sc, b_sc, *, l_tile=128):
    """pooled: [N, C] f32.  w_sc: ConvTranspose2d weight [2C, Cout, Hh, Wh].
    Returns the residual as [N, Cout, Hh*Wh] (NCHW-flat, ready for the main kernel)."""
    N, C = pooled.shape
    Cmid = w_se1.shape[0]
    C2 = w_se2.shape[0]
    _, Cout, Hh, Wh = w_sc.shape
    P = Hh * Wh
    L = Cout * P

    w1t = jnp.transpose(w_se1).astype(jnp.float32)          # [C, Cmid]
    b1r = b_se1.reshape(1, Cmid).astype(jnp.float32)
    w2t = jnp.transpose(w_se2).astype(jnp.float32)          # [Cmid, C2]
    b2r = b_se2.reshape(1, C2).astype(jnp.float32)
    # ConvTranspose weight [C2, Cout, Hh, Wh] -> NCHW-flat columns (co*P + i*Wh + j).
    wsf = w_sc.reshape(C2, L).astype(jnp.float32)
    bsf = jnp.repeat(b_sc.astype(jnp.float32), P).reshape(1, L)

    lt = min(_round_up(l_tile, 128), _round_up(L, 128))
    l_pad = _round_up(L, lt)
    if l_pad != L:
        wsf = jnp.pad(wsf, ((0, 0), (0, l_pad - L)))
        bsf = jnp.pad(bsf, ((0, 0), (0, l_pad - L)))

    out = pl.pallas_call(
        _se_gate_scaler_kernel,
        out_shape=jax.ShapeDtypeStruct((N, l_pad), jnp.float32),
        grid=(l_pad // lt,),
        in_specs=[
            pl.BlockSpec((N, C), lambda l: (0, 0)),
            pl.BlockSpec((C, Cmid), lambda l: (0, 0)),
            pl.BlockSpec((1, Cmid), lambda l: (0, 0)),
            pl.BlockSpec((Cmid, C2), lambda l: (0, 0)),
            pl.BlockSpec((1, C2), lambda l: (0, 0)),
            pl.BlockSpec((C2, lt), lambda l: (0, l)),
            pl.BlockSpec((1, lt), lambda l: (0, l)),
        ],
        out_specs=pl.BlockSpec((N, lt), lambda l: (0, l)),
        compiler_params=pltpu.CompilerParams(dimension_semantics=("parallel",)),
    )(pooled, w1t, b1r, w2t, b2r, wsf, bsf)
    return out[:, :L].reshape(N, Cout, P)


# ---------------------------------------------------------------------------
# Kernel C: fused main branch.
#   conv1(3x3, pad 1) evaluated only at stride-2 positions (9 in-kernel shifted-
#   tap matmuls over parity-phase slabs) + folded bn1 + ReLU + conv2(1x1) +
#   folded bn2 + SE residual add + ReLU, emitted channel-major (NCHW-flat).
# ---------------------------------------------------------------------------
def _main_branch_kernel(xee_ref, xeo_ref, xoe_ref, xoo_ref, w1_ref, s1_ref,
                        sh1_ref, w2_ref, s2_ref, sh2_ref, res_ref, o_ref,
                        *, Hh, Wh, Cin, C2):
    # The four (row-parity, col-parity) phases of the zero-padded NHWC input.
    phases = ((xee_ref[0], xeo_ref[0]), (xoe_ref[0], xoo_ref[0]))
    P = Hh * Wh

    # conv1 at the stride-2 output positions: tap (ky,kx) for output (i,j) lives at
    # padded coords (2i+ky, 2j+kx) == phase[ky%2][kx%2][i + ky//2, j + kx//2].
    acc = jnp.zeros((P, C2), jnp.float32)
    for ky in range(3):
        py, oy = ky % 2, ky // 2
        for kx in range(3):
            px, ox = kx % 2, kx // 2
            tap = phases[py][px][oy:oy + Hh, ox:ox + Wh, :]          # [Hh, Wh, Cin]
            acc = acc + jnp.dot(tap.reshape(P, Cin), w1_ref[ky * 3 + kx],
                                preferred_element_type=jnp.float32)

    # bn1 (folded with conv1 bias) + ReLU.
    y = jnp.maximum(acc * s1_ref[...] + sh1_ref[...], 0.0)           # [P, C2]

    # conv2 (1x1; its stride 2 is already absorbed by the strided taps) + bn2,
    # computed channel-major so the result is already NCHW-flat.
    z = jnp.dot(w2_ref[...], y.T, preferred_element_type=jnp.float32)  # [Cout, P]
    z = z * s2_ref[...] + sh2_ref[...] + res_ref[0]
    o_ref[0] = jnp.maximum(z, 0.0)


def fused_main_branch(x, residual_cm, conv1_w, conv1_b, bn1, conv2_w, bn2,
                      *, eps=1e-5, gemm_dtype=jnp.float32):
    """x: [N, Cin, H, W]; residual_cm: [N, Cout, Hh*Wh] (NCHW-flat SE residual).
    Returns relu(bn2(conv2(relu(bn1(conv1(x))))) + residual) as [N, Cout, Hh, Wh]."""
    N, Cin, H, W = x.shape
    assert H % 2 == 0 and W % 2 == 0
    C2 = conv1_w.shape[0]
    Cout = conv2_w.shape[0]
    Hh, Wh = H // 2, W // 2
    P = Hh * Wh

    # Parity-phase relayout of the zero-padded NHWC input (wrapper-side layout
    # plumbing, ~1x input bytes).  Every 3x3 tap becomes a static dense slice of
    # one of these slabs inside the kernel: no 9x im2col tensor, no full-res
    # conv1 activation in HBM.
    xh = jnp.transpose(x, (0, 2, 3, 1)).astype(gemm_dtype)            # NHWC
    xp = jnp.pad(xh, ((0, 0), (1, 1), (1, 1), (0, 0)))
    x_ee = xp[:, 0::2, 0::2, :]                                       # [N, Hh+1, Wh+1, Cin]
    x_eo = xp[:, 0::2, 1::2, :]
    x_oe = xp[:, 1::2, 0::2, :]
    x_oo = xp[:, 1::2, 1::2, :]

    # conv1 weight -> [9, Cin, C2]; fold conv1 bias + eval-mode bn1 to scale/shift.
    w1r = jnp.transpose(conv1_w, (2, 3, 1, 0)).reshape(9, Cin, C2).astype(gemm_dtype)
    g1, b1, m1, v1 = bn1
    s1 = (g1 / jnp.sqrt(v1 + eps)).astype(jnp.float32)
    scale1 = s1.reshape(1, C2)
    shift1 = ((conv1_b - m1) * s1 + b1).reshape(1, C2).astype(jnp.float32)

    # conv2 (1x1, bias=False) weight channel-major; fold eval-mode bn2.
    w2cm = conv2_w.reshape(Cout, C2).astype(jnp.float32)
    g2, b2, m2, v2 = bn2
    s2 = (g2 / jnp.sqrt(v2 + eps)).astype(jnp.float32)
    scale2 = s2.reshape(Cout, 1)
    shift2 = (b2 - m2 * s2).reshape(Cout, 1).astype(jnp.float32)

    res = residual_cm.astype(jnp.float32)

    kern = functools.partial(_main_branch_kernel, Hh=Hh, Wh=Wh, Cin=Cin, C2=C2)
    out = pl.pallas_call(
        kern,
        out_shape=jax.ShapeDtypeStruct((N, Cout, P), jnp.float32),
        grid=(N,),
        in_specs=[
            pl.BlockSpec((1, Hh + 1, Wh + 1, Cin), lambda n: (n, 0, 0, 0)),
            pl.BlockSpec((1, Hh + 1, Wh + 1, Cin), lambda n: (n, 0, 0, 0)),
            pl.BlockSpec((1, Hh + 1, Wh + 1, Cin), lambda n: (n, 0, 0, 0)),
            pl.BlockSpec((1, Hh + 1, Wh + 1, Cin), lambda n: (n, 0, 0, 0)),
            pl.BlockSpec((9, Cin, C2), lambda n: (0, 0, 0)),
            pl.BlockSpec((1, C2), lambda n: (0, 0)),
            pl.BlockSpec((1, C2), lambda n: (0, 0)),
            pl.BlockSpec((Cout, C2), lambda n: (0, 0)),
            pl.BlockSpec((Cout, 1), lambda n: (0, 0)),
            pl.BlockSpec((Cout, 1), lambda n: (0, 0)),
            pl.BlockSpec((1, Cout, P), lambda n: (n, 0, 0)),
        ],
        out_specs=pl.BlockSpec((1, Cout, P), lambda n: (n, 0, 0)),
        compiler_params=pltpu.CompilerParams(dimension_semantics=("parallel",)),
    )(x_ee, x_eo, x_oe, x_oo, w1r, scale1, shift1, w2cm, scale2, shift2, res)
    return out.reshape(N, Cout, Hh, Wh)                               # already NCHW


# ---------------------------------------------------------------------------
# Full SE_ResNet forward (downsampling=True, eval-mode BatchNorm)
# ---------------------------------------------------------------------------
def se_resnet_forward(x, params, *, se_hw_tile=4096, gemm_dtype=jnp.float32):
    # SE residual branch on the identity input.
    pooled = se_global_avg_pool(x, hw_tile=se_hw_tile)                 # [N, Cin] f32
    residual_cm = se_gate_and_scaler(
        pooled, params["se_w1"], params["se_b1"], params["se_w2"], params["se_b2"],
        params["scaler_w"], params["scaler_b"])                        # [N, Cout, Hh*Wh]

    # Fused main branch + residual add + ReLU, emitted directly in NCHW layout.
    out = fused_main_branch(
        x, residual_cm,
        params["conv1_w"], params["conv1_b"],
        (params["bn1_gamma"], params["bn1_beta"], params["bn1_mean"], params["bn1_var"]),
        params["conv2_w"],
        (params["bn2_gamma"], params["bn2_beta"], params["bn2_mean"], params["bn2_var"]),
        gemm_dtype=gemm_dtype)
    return out                                                         # [N, Cout, H/2, W/2]


# ---------------------------------------------------------------------------
# Pure-JAX (XLA) reference of the PyTorch forward, for verification.
# ---------------------------------------------------------------------------
def se_resnet_reference(x, params, *, eps=1e-5):
    def bn(z, g, b, m, v):
        return (z - m[None, :, None, None]) / jnp.sqrt(v[None, :, None, None] + eps) \
               * g[None, :, None, None] + b[None, :, None, None]

    out = jax.lax.conv_general_dilated(
        x, params["conv1_w"], window_strides=(1, 1), padding=((1, 1), (1, 1)),
        dimension_numbers=("NCHW", "OIHW", "NCHW"))
    out = out + params["conv1_b"][None, :, None, None]
    out = jnp.maximum(bn(out, params["bn1_gamma"], params["bn1_beta"],
                         params["bn1_mean"], params["bn1_var"]), 0.0)
    out = jax.lax.conv_general_dilated(
        out, params["conv2_w"], window_strides=(2, 2), padding=((0, 0), (0, 0)),
        dimension_numbers=("NCHW", "OIHW", "NCHW"))
    out = bn(out, params["bn2_gamma"], params["bn2_beta"],
             params["bn2_mean"], params["bn2_var"])

    pooled = x.mean(axis=(2, 3))                                       # [N, Cin]
    h = pooled @ params["se_w1"].T + params["se_b1"]
    h = jnp.where(h > 0, h, 0.01 * h)                                  # LeakyReLU(0.01)
    g = jax.nn.sigmoid(h @ params["se_w2"].T + params["se_b2"])        # [N, 2Cin]
    residual = jnp.einsum("nc,cohw->nohw", g, params["scaler_w"]) \
               + params["scaler_b"][None, :, None, None]
    return jnp.maximum(out + residual, 0.0)


if __name__ == "__main__":
    # SE_ResNet(input_channel_dim=4, output_channel_dim=6, reduction_ratio=2,
    #           downsampling=True, imgSize=(16, 16)); eval-mode BatchNorm.
    N, Cin, H, W = 2, 4, 16, 16
    Cout, red = 6, 2
    C2 = Cin * 2
    Cmid = Cin // red
    Hh, Wh = H // 2, W // 2

    key = jax.random.PRNGKey(0)
    ks = jax.random.split(key, 18)

    def bf16_exact(a):
        # Round data to bf16-representable values so the f32 comparison against the
        # XLA reference is insensitive to the MXU's bf16-pass rounding of operands.
        return a.astype(jnp.bfloat16).astype(jnp.float32)

    x = bf16_exact(jax.random.normal(ks[0], (N, Cin, H, W), dtype=jnp.float32))

    params = dict(
        conv1_w=0.1 * jax.random.normal(ks[1], (C2, Cin, 3, 3), jnp.float32),
        conv1_b=0.1 * jax.random.normal(ks[2], (C2,), jnp.float32),
        bn1_gamma=1.0 + 0.1 * jax.random.normal(ks[3], (C2,), jnp.float32),
        bn1_beta=0.1 * jax.random.normal(ks[4], (C2,), jnp.float32),
        bn1_mean=0.1 * jax.random.normal(ks[5], (C2,), jnp.float32),
        bn1_var=1.0 + 0.1 * jnp.abs(jax.random.normal(ks[6], (C2,), jnp.float32)),
        conv2_w=0.1 * jax.random.normal(ks[7], (Cout, C2, 1, 1), jnp.float32),
        bn2_gamma=1.0 + 0.1 * jax.random.normal(ks[8], (Cout,), jnp.float32),
        bn2_beta=0.1 * jax.random.normal(ks[9], (Cout,), jnp.float32),
        bn2_mean=0.1 * jax.random.normal(ks[10], (Cout,), jnp.float32),
        bn2_var=1.0 + 0.1 * jnp.abs(jax.random.normal(ks[11], (Cout,), jnp.float32)),
        se_w1=0.1 * jax.random.normal(ks[12], (Cmid, Cin), jnp.float32),
        se_b1=0.1 * jax.random.normal(ks[13], (Cmid,), jnp.float32),
        se_w2=0.1 * jax.random.normal(ks[14], (C2, Cmid), jnp.float32),
        se_b2=0.1 * jax.random.normal(ks[15], (C2,), jnp.float32),
        scaler_w=0.1 * jax.random.normal(ks[16], (C2, Cout, Hh, Wh), jnp.float32),
        scaler_b=0.1 * jax.random.normal(ks[17], (Cout,), jnp.float32),
    )
    params = {k: bf16_exact(v) for k, v in params.items()}

    # se_hw_tile=128 so the demo exercises the multi-step spatial accumulation path.
    out = se_resnet_forward(x, params, se_hw_tile=128)
    jax.block_until_ready(out)

    ref = se_resnet_reference(x, params)

    assert out.shape == (N, Cout, Hh, Wh), out.shape
    assert bool(jnp.all(jnp.isfinite(out)))
    assert bool(jnp.allclose(out, ref, rtol=5e-3, atol=5e-3)), \
        float(jnp.max(jnp.abs(out - ref)))
    print("KERNEL_OK")
</pallas_src>

<mosaic_0001>
module attributes {stable_mosaic.version = 11 : i64} {
  func.func @_se_pool_kernel(%arg0: i32, %arg1: i32, %arg2: memref<8x128xf32, #tpu.memory_space<vmem>>, %arg3: memref<8x1xf32, #tpu.memory_space<vmem>>, %arg4: memref<8x128xf32, #tpu.memory_space<vmem>>) attributes {dimension_semantics = [#tpu.dimension_semantics<parallel>, #tpu.dimension_semantics<arbitrary>], iteration_bounds = array<i64: 1, 2>, scalar_prefetch = 0 : i64, scratch_operands = 1 : i64, tpu.core_type = #tpu.core_type<tc>, window_params = [{transform_indices = @transform_0, window_bounds = array<i64: 8, 128>}, {transform_indices = @transform_1, window_bounds = array<i64: 8, 1>}]} {
    %c0_i32 = arith.constant 0 : i32
    %0 = arith.cmpi eq, %arg1, %c0_i32 : i32
    %1 = arith.extui %0 : i1 to i32
    %c0_i32_0 = arith.constant 0 : i32
    %2 = arith.cmpi ne, %1, %c0_i32_0 : i32
    scf.if %2 {
      %cst_7 = arith.constant 0.000000e+00 : f32
      %12 = vector.broadcast %cst_7 : f32 to vector<8x128xf32>
      %c0_8 = arith.constant 0 : index
      %c0_9 = arith.constant 0 : index
      %13 = vector.load %arg4[%c0_8, %c0_9] : memref<8x128xf32, #tpu.memory_space<vmem>>, vector<8x128xf32>
      tpu.vector_store %arg4[%c0_8, %c0_9], %12 {strides = array<i32>} : memref<8x128xf32, #tpu.memory_space<vmem>>, vector<8x128xf32>,
    } else {
    }
    %c0 = arith.constant 0 : index
    %c0_1 = arith.constant 0 : index
    %3 = vector.load %arg2[%c0, %c0_1] : memref<8x128xf32, #tpu.memory_space<vmem>>, vector<8x128xf32>
    %c0_2 = arith.constant 0 : index
    %c0_3 = arith.constant 0 : index
    %4 = vector.load %arg4[%c0_2, %c0_3] : memref<8x128xf32, #tpu.memory_space<vmem>>, vector<8x128xf32>
    %5 = vector.shape_cast %3 : vector<8x128xf32> to vector<8x1x128xf32>
    %cst = arith.constant dense<0.000000e+00> : vector<8x128xf32>
    %6 = vector.multi_reduction <add>, %5, %cst [1] : vector<8x1x128xf32> to vector<8x128xf32>
    %7 = arith.addf %4, %6 : vector<8x128xf32>
    %c0_4 = arith.constant 0 : index
    %c0_5 = arith.constant 0 : index
    %8 = vector.load %arg4[%c0_4, %c0_5] : memref<8x128xf32, #tpu.memory_space<vmem>>, vector<8x128xf32>
    tpu.vector_store %arg4[%c0_4, %c0_5], %7 {strides = array<i32>} : memref<8x128xf32, #tpu.memory_space<vmem>>, vector<8x128xf32>,
    %c1_i32 = arith.constant 1 : i32
    %9 = arith.cmpi eq, %arg1, %c1_i32 : i32
    %10 = arith.extui %9 : i1 to i32
    %c0_i32_6 = arith.constant 0 : i32
    %11 = arith.cmpi ne, %10, %c0_i32_6 : i32
    scf.if %11 {
      %c0_7 = arith.constant 0 : index
      %c0_8 = arith.constant 0 : index
      %12 = vector.load %arg4[%c0_7, %c0_8] : memref<8x128xf32, #tpu.memory_space<vmem>>, vector<8x128xf32>
      %cst_9 = arith.constant dense<0.000000e+00> : vector<8xf32>
      %13 = vector.multi_reduction <add>, %12, %cst_9 [1] : vector<8x128xf32> to vector<8xf32>
      %14 = vector.shape_cast %13 : vector<8xf32> to vector<8x1xf32>
      %cst_10 = arith.constant 3.906250e-03 : f32
      %15 = vector.broadcast %cst_10 : f32 to vector<8x1xf32>
      %16 = arith.mulf %14, %15 : vector<8x1xf32>
      %c0_11 = arith.constant 0 : index
      %c0_12 = arith.constant 0 : index
      %17 = vector.load %arg3[%c0_11, %c0_12] : memref<8x1xf32, #tpu.memory_space<vmem>>, vector<8x1xf32>
      tpu.vector_store %arg3[%c0_11, %c0_12], %16 {strides = array<i32>} : memref<8x1xf32, #tpu.memory_space<vmem>>, vector<8x1xf32>,
    } else {
    }
    return
  }
  func.func @transform_0(%arg0: i32, %arg1: i32) -> (i32, i32) {
    %c0_i32 = arith.constant 0 : i32
    return %arg0, %arg1 : i32, i32
  }
  func.func @transform_1(%arg0: i32, %arg1: i32) -> (i32, i32) {
    %c0_i32 = arith.constant 0 : i32
    %c0_i32_0 = arith.constant 0 : i32
    return %arg0, %c0_i32 : i32, i32
  }
}

</mosaic_0001>

<bundles_post_ra>
// kernel: tpu_custom_call.1
= control target key start
LH: loop header
LB: loop body
LE: loop exit
PB: predicated region body
PF: predicated region fallthrough
CT: control target
= control target key end

     0   :  { %6 = vsyncpa [#allocation4], 0  ;;  %s491_s0 = inlined_call_operand.hbm [shape: f32[8,256], index: 0, kind: input, shape index: {}]   ;;  %s492_s1 = inlined_call_operand.vmem [shape: f32[8,1], index: 1, kind: output, shape index: {}]  }
   0x1   :  { %8 = vsyncpa [#allocation4 + $0x1], 0  ;;  %s403_s6 = smov 0   ;;  %s405_s7 = smov 0  }
   0x2   :  { %s407_s8 = smov 0   ;;  %s409_s9 = smov 0  }
   0x3   :  { %s411_s10 = smov 0   ;;  %s413_s11 = smov 0  }
   0x4 LB: > { %s242_s12 = sadd.s32 4294967295, %s390_s11   ;;  %s23_s13 = sadd.s32 1, %s386_s10  ;;  %s390_s11 = sphi %s413_s11, %s14_s11   ;;  %s386_s10 = sphi %s411_s10, %s499_s10   ;;  %s382_s9 = sphi %s409_s9, %s498_s9   ;;  %s378_s8 = sphi %s407_s8, %s497_s8   ;;  %s374_s7 = sphi %s405_s7, %s496_s7   ;;  %s370_s6 = sphi %s403_s6, %s495_s6  }
   0x5   : > { %p24_p0 = scmp.ge.s32.totalorder %s23_s13, 2  ;;  %s35_s14 = sadd.s32 1, %s378_s8 }
   0x6   : > { %p42_p1 = scmp.ne.s32.totalorder %s378_s8, %s374_s7  ;;  %p43_p2 = scmp.eq.s32.totalorder %s390_s11, 0 }
   0x7   : > { %s501_s13 = smov (%p24_p0, %s23_s13), 0  ;;  %p48_p4 = scmp.ne.s32.totalorder %s374_s7, %s370_s6 }
   0x8   : > { %p439_p3 = por %p43_p2, %p42_p1  ;;  %s31_s16 = ssub.s32 %s386_s10, %s501_s13 }
   0x9   : > { %p49_p5 = scmp.eq.s32.totalorder %s242_s12, 0  ;;  %p33_p6 = scmp.eq.s32.totalorder %s31_s16, 0 }
   0xa   : > { %p260_p8 = scmp.lt.s32.totalorder %s390_s11, 2  ;;  %s98_s19 = sand.u32 1, %s378_s8  }
   0xb   : > { %p446_p7 = por %p49_p5, %p48_p4  ;;  %s246_s20 = sshll.u32 %s386_s10, 3 }
   0xc   : > { %s452_s18 = scalar_select %p33_p6, %s378_s8, %s35_s14  }
   0xd   : > { %s245_s21 = sshll.u32 %s98_s19, 3  ;;  %s108_s24 = scalar_lea.hbm %s491_s0, %s246_s20 }
   0xe   : > { %s110_s25 = sshll.u32 %s108_s24, 4  ;;  %s102_s26 = scalar_lea.vmem [#allocation3], %s245_s21  ;;  %s111_s25 = int_to_ptr.hbm [resolvable:$true] %s110_s25 }
   0xf   : > { %s112_s27 = sshll.u32 %s102_s26, 4  ;;  %p257_p9 = pnand %p260_p8, %p439_p3  ;;  %s113_s27 = int_to_ptr.vmem [resolvable:$true] %s112_s27 }
  0x10   : > { %p247_p10 = scmp.ge.s32.totalorder %s390_s11, 1  ;;  %p117_p11 = scmp.lt.s32.totalorder %s390_s11, 3 }
  0x11   : > { %s99_s28 = scalar_lea.sflag [#allocation4], %s98_s19 }
  0x12   : > { %259 = dma.hbm_to_vmem [thread:$0]  (!%p257_p9), %s111_s25, 128, %s113_s27, %s99_s28  }
  0x13   : > { %p118_p12 = pnand %p247_p10, %p117_p11 }
  0x14   : > { %s123_s29 = sand.u32 (!%p118_p12), 1, %s374_s7  }
  0x15   : > { %121 = sbr.rel (%p118_p12) target bundleno = 172 (0xac), region = 24  ;;  %s248_s30 = sshll.u32 (!%p118_p12), %s123_s29, 3 }
  0x16   : > { %s124_s2 = scalar_lea.sflag (!%p118_p12), [#allocation4], %s123_s29  ;;  %s127_s3 = scalar_lea.vmem (!%p118_p12), [#allocation3], %s248_s30 }
  0x1a   : > { %365 = dma.done.wait (%p446_p7), %s124_s2, 128  }
  0x1b   : > { %367 = vsyncadd (%p446_p7), %s124_s2, 4294967168  ;;  %p249_p13 = scmp.ne.s32.totalorder %s382_s9, 0 }
  0x1d   : > { %153 = sbr.rel (%p249_p13) target bundleno = 36 (0x24), region = 32 }
  0x22   : > { %v392_v0 = vmov 0.0  }
  0x23   : > { %154 = vst [vmem:[#allocation2] sm:$0xff] %v392_v0 }
  0x24 PF: > { %v155_v1 = vld [vmem:[%s127_s3] sm:$0xff]  ;;  %p250_p0 = scmp.ne.s32.totalorder %s382_s9, 1 }
  0x29   : > { %163 = sbr.rel (%p250_p0) target bundleno = 172 (0xac), region = 36 }
  0x2a   : > { %v156_v2 = vld [vmem:[#allocation2] sm:$0xff] }
  0x2b   : > { %v158_v3 = vadd.f32 %v156_v2, %v155_v1 }
  0x2d   : > { %159 = vst [vmem:[#allocation2] sm:$0xff] %v158_v3 }
  0x2e   : > { %vm168_vm0 = vcmask 7168  }
  0x34   : > { %v164_v4 = vld [vmem:[#allocation2] sm:$0xff] }
  0x35   : > { %165 = vadd.xlane.f32.xlu0 %v164_v4 }
  0xa8   : > { %v166_v5 = vpop.xlane.xlu0 %165 }
  0xa9   : > { %v167_v6 = vmul.f32 0.00390625, %v166_v5 }
  0xab   : > { %169 = vst.msk [vmem:[%s492_s1] sm:$0xff] %vm168_vm0, %v167_v6 }
  0xac PF: > { %s14_s11 = sadd.s32 1, %s390_s11   ;;  %s495_s6 = smov %s374_s7 }
  0xad   : > { %p11_p1 = scmp.ge.s32.totalorder %s14_s11, 4   ;;  %s496_s7 = smov %s378_s8 }
  0xae   : > { %s497_s8 = smov %s452_s18  ;;  %s498_s9 = smov %s386_s10 }
  0xaf   : > { %s499_s10 = smov %s501_s13  ;;  %13 = sbr.rel (!%p11_p1) target bundleno = 4 (0x4), region = 72 }
  0xb4   :  { %189 = vsyncpa [#allocation4], 1 }
  0xb5   :  { %191 = vsyncpa [#allocation4 + $0x1], 1 }

</bundles_post_ra>
